<compile_context>
chip_gen: v7x
topology: tpu7x:2x2x1
jax: 0.10.0
libtpu: 0.0.40
codegen_flags: <defaults>
</compile_context>

<pallas_src>
import math

import jax
import jax.numpy as jnp
from jax.experimental import pallas as pl
from jax.experimental.pallas import tpu as pltpu


def _d_net_kernel(logits_ref, targets_ref, c_ref, w02_ref, w12_ref, b_ref, out_ref):
    logits = logits_ref[...]                     # (TB, D) f32
    targets = targets_ref[...]                   # (TB, D) f32

    # s = sigmoid((1 + |c|) * logits) -- keep VPU/EUP math in f32 (v5e has no bf16 VPU/EUP).
    scale = 1.0 + jnp.abs(c_ref[...])            # (1, D), resident block, broadcasts over rows
    s = jax.nn.sigmoid(scale * logits)           # EUP
    st = s * targets

    # Folded matmuls: z = s @ (W0+W2) + (s*t) @ (W1-W2) + b   (f32 accumulation)
    mxu_dtype = w02_ref.dtype
    z = (jnp.dot(s.astype(mxu_dtype), w02_ref[...],
                 preferred_element_type=jnp.float32)
         + jnp.dot(st.astype(mxu_dtype), w12_ref[...],
                   preferred_element_type=jnp.float32)
         + b_ref[...])                           # (TB, P) f32

    # Single output slab: [:, :P] = z_hat, [:, P:] = sigmoid(z_hat)
    P = b_ref.shape[-1]
    out_ref[:, :P] = z.astype(out_ref.dtype)
    out_ref[:, P:] = jax.nn.sigmoid(z).astype(out_ref.dtype)


def d_net_forward(logits, targets, c, w2, b, *,
                  mxu_dtype=jnp.bfloat16, batch_tile=1024):
    """Pallas-backed D_net.forward; returns (z_hat, sigmoid(z_hat)).

    NOTE: at tiny shapes (B~8, D=32) this is launch/DMA-overhead bound and plain
    XLA fusion is at least as fast; the Pallas path pays off once B is large and
    the batch grid + pipelining kicks in.
    """
    B, D = logits.shape
    P = int(c.shape[0])
    # The (1 + |c|) * logits broadcast (as in the PyTorch module) requires P == D.
    assert P == D, f"protected_dim ({P}) must equal input_dim ({D})"
    assert w2.shape == (3 * D, P), f"expected w2 shape {(3 * D, P)}, got {w2.shape}"
    assert batch_tile % 8 == 0, "batch_tile must be a multiple of 8 (sublane)"

    # One-time weight fold (outside the kernel): W02 = W0 + W2, W12 = W1 - W2.
    w2f = w2.astype(jnp.float32)
    w0, w1, wl = w2f[:D], w2f[D:2 * D], w2f[2 * D:]
    w02 = (w0 + wl).astype(mxu_dtype)            # (D, P)
    w12 = (w1 - wl).astype(mxu_dtype)            # (D, P)

    c2 = c.reshape(1, P).astype(jnp.float32)
    b2 = b.reshape(1, P).astype(jnp.float32)

    # Batch tile: full batch if small, else 1024 rows (double-buffered inputs+outputs
    # stay ~1 MiB, well under v7x's 32 MiB scoped / 64 MiB physical VMEM).
    TB = B if B <= batch_tile else batch_tile
    grid = (pl.cdiv(B, TB),)

    out = pl.pallas_call(
        _d_net_kernel,
        out_shape=jax.ShapeDtypeStruct((B, 2 * P), jnp.float32),
        grid=grid,
        in_specs=[
            pl.BlockSpec((TB, D), lambda i: (i, 0)),   # logits  (tiled over batch)
            pl.BlockSpec((TB, D), lambda i: (i, 0)),   # targets (tiled over batch)
            pl.BlockSpec((1, P), lambda i: (0, 0)),    # c       (VMEM-resident)
            pl.BlockSpec((D, P), lambda i: (0, 0)),    # W0+W2   (VMEM-resident)
            pl.BlockSpec((D, P), lambda i: (0, 0)),    # W1-W2   (VMEM-resident)
            pl.BlockSpec((1, P), lambda i: (0, 0)),    # b       (VMEM-resident)
        ],
        out_specs=pl.BlockSpec((TB, 2 * P), lambda i: (i, 0)),
        compiler_params=pltpu.CompilerParams(
            dimension_semantics=("parallel",)),        # v7x: shard batch over 2 TCs
    )(logits.astype(jnp.float32), targets.astype(jnp.float32),
      c2, w02, w12, b2)

    return out[:, :P], out[:, P:]


def d_net_reference(logits, targets, c, w2, b):
    """Pure-JAX mirror of the PyTorch forward (for correctness check)."""
    s = jax.nn.sigmoid((1.0 + jnp.abs(c)) * logits)
    x = jnp.concatenate((s, s * targets, s * (1.0 - targets)), axis=1)
    z = x @ w2 + b
    return z, jax.nn.sigmoid(z)


if __name__ == "__main__":
    key = jax.random.PRNGKey(0)
    k_logits, k_targets, k_w2 = jax.random.split(key, 3)

    B = 8
    input_dim = 32
    protected_dim = 32      # must equal input_dim for the (1+|c|)*logits broadcast
    no_targets = 3          # equality_of_odds=True

    # Deterministic parameter init mirroring __init__:
    #   c = ones(P), b = zeros(P), w2 = xavier_uniform((3*input_dim, P))
    c = jnp.ones((protected_dim,), dtype=jnp.float32)
    b = jnp.zeros((protected_dim,), dtype=jnp.float32)
    fan_out, fan_in = no_targets * input_dim, protected_dim
    bound = math.sqrt(6.0 / (fan_in + fan_out))
    w2 = jax.random.uniform(k_w2, (no_targets * input_dim, protected_dim),
                            minval=-bound, maxval=bound, dtype=jnp.float32)

    logits = jax.random.normal(k_logits, (B, input_dim), dtype=jnp.float32)
    targets = jax.random.bernoulli(k_targets, 0.5, (B, input_dim)).astype(jnp.float32)

    z_ref, sig_ref = d_net_reference(logits, targets, c, w2, b)

    # 1) f32 MXU path: tight tolerance against the reference.
    z32, s32 = d_net_forward(logits, targets, c, w2, b, mxu_dtype=jnp.float32)
    jax.block_until_ready((z32, s32))
    assert z32.shape == (B, protected_dim) and s32.shape == (B, protected_dim)
    assert jnp.allclose(z32, z_ref, atol=1e-5, rtol=1e-5)
    assert jnp.allclose(s32, sig_ref, atol=1e-5, rtol=1e-5)

    # 2) Default bf16-MXU path (v6e/v7x friendly), f32 accumulation: loose tolerance.
    zbf, sbf = d_net_forward(logits, targets, c, w2, b)
    jax.block_until_ready((zbf, sbf))
    assert zbf.shape == (B, protected_dim) and sbf.shape == (B, protected_dim)
    assert jnp.allclose(zbf, z_ref, atol=2e-2, rtol=2e-2)
    assert jnp.allclose(sbf, sig_ref, atol=2e-2, rtol=2e-2)

    print("KERNEL_OK")
</pallas_src>

<mosaic_0001>
module attributes {stable_mosaic.version = 11 : i64} {
  func.func @_d_net_kernel(%arg0: i32, %arg1: memref<8x32xf32, #tpu.memory_space<vmem>>, %arg2: memref<8x32xf32, #tpu.memory_space<vmem>>, %arg3: memref<1x32xf32, #tpu.memory_space<vmem>>, %arg4: memref<32x32xf32, #tpu.memory_space<vmem>>, %arg5: memref<32x32xf32, #tpu.memory_space<vmem>>, %arg6: memref<1x32xf32, #tpu.memory_space<vmem>>, %arg7: memref<8x64xf32, #tpu.memory_space<vmem>>) attributes {dimension_semantics = [#tpu.dimension_semantics<parallel>], iteration_bounds = array<i64: 1>, scalar_prefetch = 0 : i64, scratch_operands = 0 : i64, tpu.core_type = #tpu.core_type<tc>, window_params = [{transform_indices = @transform_0, window_bounds = array<i64: 8, 32>}, {transform_indices = @transform_1, window_bounds = array<i64: 8, 32>}, {pipeline_mode = #tpu.pipeline_mode<synchronous>, transform_indices = @transform_2, window_bounds = array<i64: 1, 32>}, {pipeline_mode = #tpu.pipeline_mode<synchronous>, transform_indices = @transform_3, window_bounds = array<i64: 32, 32>}, {pipeline_mode = #tpu.pipeline_mode<synchronous>, transform_indices = @transform_4, window_bounds = array<i64: 32, 32>}, {pipeline_mode = #tpu.pipeline_mode<synchronous>, transform_indices = @transform_5, window_bounds = array<i64: 1, 32>}, {transform_indices = @transform_6, window_bounds = array<i64: 8, 64>}]} {
    %c0 = arith.constant 0 : index
    %c0_0 = arith.constant 0 : index
    %0 = vector.load %arg1[%c0, %c0_0] : memref<8x32xf32, #tpu.memory_space<vmem>>, vector<8x32xf32>
    %c0_1 = arith.constant 0 : index
    %c0_2 = arith.constant 0 : index
    %1 = vector.load %arg2[%c0_1, %c0_2] : memref<8x32xf32, #tpu.memory_space<vmem>>, vector<8x32xf32>
    %c0_3 = arith.constant 0 : index
    %c0_4 = arith.constant 0 : index
    %2 = vector.load %arg3[%c0_3, %c0_4] : memref<1x32xf32, #tpu.memory_space<vmem>>, vector<1x32xf32>
    %3 = math.absf %2 : vector<1x32xf32>
    %cst = arith.constant 1.000000e+00 : f32
    %4 = vector.broadcast %cst : f32 to vector<1x32xf32>
    %5 = arith.addf %4, %3 : vector<1x32xf32>
    %6 = vector.broadcast %5 : vector<1x32xf32> to vector<8x32xf32>
    %7 = arith.mulf %6, %0 : vector<8x32xf32>
    %8 = arith.negf %7 : vector<8x32xf32>
    %9 = math.exp %8 : vector<8x32xf32>
    %cst_5 = arith.constant 1.000000e+00 : f32
    %10 = vector.broadcast %cst_5 : f32 to vector<8x32xf32>
    %11 = arith.addf %10, %9 : vector<8x32xf32>
    %12 = arith.divf %10, %11 : vector<8x32xf32>
    %13 = arith.mulf %12, %1 : vector<8x32xf32>
    %c0_6 = arith.constant 0 : index
    %c0_7 = arith.constant 0 : index
    %14 = vector.load %arg4[%c0_6, %c0_7] : memref<32x32xf32, #tpu.memory_space<vmem>>, vector<32x32xf32>
    %cst_8 = arith.constant dense<0.000000e+00> : vector<8x32xf32>
    %15 = tpu.matmul %12, %14, %cst_8 {dimension_numbers = #tpu.dot_dimension_numbers<[1], [0], [0], [1], [0, 0, 1, 1], [], []>} : vector<8x32xf32>, vector<32x32xf32>, vector<8x32xf32> -> vector<8x32xf32>
    %c0_9 = arith.constant 0 : index
    %c0_10 = arith.constant 0 : index
    %16 = vector.load %arg5[%c0_9, %c0_10] : memref<32x32xf32, #tpu.memory_space<vmem>>, vector<32x32xf32>
    %cst_11 = arith.constant dense<0.000000e+00> : vector<8x32xf32>
    %17 = tpu.matmul %13, %16, %cst_11 {dimension_numbers = #tpu.dot_dimension_numbers<[1], [0], [0], [1], [0, 0, 1, 1], [], []>} : vector<8x32xf32>, vector<32x32xf32>, vector<8x32xf32> -> vector<8x32xf32>
    %18 = arith.addf %15, %17 : vector<8x32xf32>
    %c0_12 = arith.constant 0 : index
    %c0_13 = arith.constant 0 : index
    %19 = vector.load %arg6[%c0_12, %c0_13] : memref<1x32xf32, #tpu.memory_space<vmem>>, vector<1x32xf32>
    %20 = vector.broadcast %19 : vector<1x32xf32> to vector<8x32xf32>
    %21 = arith.addf %18, %20 : vector<8x32xf32>
    %c0_14 = arith.constant 0 : index
    %c0_15 = arith.constant 0 : index
    %22 = vector.load %arg7[%c0_14, %c0_15] : memref<8x64xf32, #tpu.memory_space<vmem>>, vector<8x32xf32>
    tpu.vector_store %arg7[%c0_14, %c0_15], %21 {strides = array<i32>} : memref<8x64xf32, #tpu.memory_space<vmem>>, vector<8x32xf32>,
    %23 = arith.negf %21 : vector<8x32xf32>
    %24 = math.exp %23 : vector<8x32xf32>
    %cst_16 = arith.constant 1.000000e+00 : f32
    %25 = vector.broadcast %cst_16 : f32 to vector<8x32xf32>
    %26 = arith.addf %25, %24 : vector<8x32xf32>
    %27 = arith.divf %25, %26 : vector<8x32xf32>
    %c0_17 = arith.constant 0 : index
    %c32 = arith.constant 32 : index
    %28 = vector.load %arg7[%c0_17, %c32] : memref<8x64xf32, #tpu.memory_space<vmem>>, vector<8x32xf32>
    tpu.vector_store %arg7[%c0_17, %c32], %27 {strides = array<i32>} : memref<8x64xf32, #tpu.memory_space<vmem>>, vector<8x32xf32>,
    return
  }
  func.func @transform_0(%arg0: i32) -> (i32, i32) {
    %c0_i32 = arith.constant 0 : i32
    %c0_i32_0 = arith.constant 0 : i32
    return %arg0, %c0_i32 : i32, i32
  }
  func.func @transform_1(%arg0: i32) -> (i32, i32) {
    %c0_i32 = arith.constant 0 : i32
    %c0_i32_0 = arith.constant 0 : i32
    return %arg0, %c0_i32 : i32, i32
  }
  func.func @transform_2(%arg0: i32) -> (i32, i32) {
    %c0_i32 = arith.constant 0 : i32
    %c0_i32_0 = arith.constant 0 : i32
    %c0_i32_1 = arith.constant 0 : i32
    return %c0_i32, %c0_i32_0 : i32, i32
  }
  func.func @transform_3(%arg0: i32) -> (i32, i32) {
    %c0_i32 = arith.constant 0 : i32
    %c0_i32_0 = arith.constant 0 : i32
    %c0_i32_1 = arith.constant 0 : i32
    return %c0_i32, %c0_i32_0 : i32, i32
  }
  func.func @transform_4(%arg0: i32) -> (i32, i32) {
    %c0_i32 = arith.constant 0 : i32
    %c0_i32_0 = arith.constant 0 : i32
    %c0_i32_1 = arith.constant 0 : i32
    return %c0_i32, %c0_i32_0 : i32, i32
  }
  func.func @transform_5(%arg0: i32) -> (i32, i32) {
    %c0_i32 = arith.constant 0 : i32
    %c0_i32_0 = arith.constant 0 : i32
    %c0_i32_1 = arith.constant 0 : i32
    return %c0_i32, %c0_i32_0 : i32, i32
  }
  func.func @transform_6(%arg0: i32) -> (i32, i32) {
    %c0_i32 = arith.constant 0 : i32
    %c0_i32_0 = arith.constant 0 : i32
    return %arg0, %c0_i32 : i32, i32
  }
}

</mosaic_0001>

<bundles_post_ra>
// kernel: tpu_custom_call.1
= control target key start
LH: loop header
LB: loop body
LE: loop exit
PB: predicated region body
PF: predicated region fallthrough
CT: control target
= control target key end

     0   :  { %11 = vsyncpa [#allocation3], 0  ;;  %s585_s0 = inlined_call_operand.hbm [shape: f32[8,32], index: 0, kind: input, shape index: {}]   ;;  %s586_s1 = inlined_call_operand.hbm [shape: f32[8,32], index: 1, kind: input, shape index: {}]   ;;  %s587_s2 = inlined_call_operand.vmem [shape: f32[1,32], index: 2, kind: input, shape index: {}]   ;;  %s588_s3 = inlined_call_operand.hbm [shape: f32[32,32], index: 3, kind: input, shape index: {}]   ;;  %s589_s4 = inlined_call_operand.hbm [shape: f32[32,32], index: 4, kind: input, shape index: {}]   ;;  %s590_s5 = inlined_call_operand.vmem [shape: f32[1,32], index: 5, kind: input, shape index: {}]   ;;  %s591_s6 = inlined_call_operand.hbm [shape: f32[8,64], index: 6, kind: output, shape index: {}]  }
   0x1   :  { %12 = vsyncpa [#allocation6], 0 }
   0x2   :  { %13 = vsyncpa [#allocation9], 0 }
   0x3   :  { %14 = vsyncpa [#allocation4], 0  ;;  %s473_s21 = smov [#allocation5]   ;;  %s474_s23 = smov [#allocation2]  }
   0x4   :  { %s31_s22 = sshll.u32 %s473_s21, 4  ;;  %s21_s24 = sshll.u32 %s474_s23, 4  ;;  %s32_s22 = int_to_ptr.vmem [resolvable:$true] %s31_s22  ;;  %s22_s24 = int_to_ptr.vmem [resolvable:$true] %s21_s24 }
   0x5   :  { %s355_s27 = scalar_lea.hbm %s586_s1, 128 }
   0x6   :  { %p356_p0 = scmp.ne.s32.totalorder %s586_s1, %s355_s27  ;;  %p359_p1 = scmp.lt.u32.totalorder %s355_s27, %s586_s1 }
   0x8   :  { %p361_p2 = pnand %p359_p1, %p356_p0 }
   0xa   :  { %364 = shalt.err (!%p361_p2)
}
   0xb   :  { %s365_s8 = scalar_lea.vmem %s32_s22, 128  ;;  %p370_p4 = scmp.lt.s32.totalorder %s32_s22, %s32_s22 }
   0xc   :  { %p366_p3 = scmp.ne.s32.totalorder %s32_s22, %s365_s8  ;;  %p371_p5 = scmp.lt.s32.totalorder %s365_s8, %s365_s8 }
   0xe   :  { %p372_p6 = por %p371_p5, %p370_p4 }
  0x10   :  { %p373_p7 = pnand %p372_p6, %p366_p3 }
  0x12   :  { %376 = shalt.err (!%p373_p7)
}
  0x13   :  { %34 = dma.hbm_to_vmem [thread:$0]  %s586_s1, 128, %s32_s22, [#allocation6]  }
  0x14   :  { %s377_s13 = scalar_lea.hbm %s585_s0, 128 }
  0x15   :  { %p378_p8 = scmp.ne.s32.totalorder %s585_s0, %s377_s13  ;;  %p381_p9 = scmp.lt.u32.totalorder %s377_s13, %s585_s0 }
  0x17   :  { %p383_p10 = pnand %p381_p9, %p378_p8 }
  0x19   :  { %386 = shalt.err (!%p383_p10)
}
  0x1a   :  { %s387_s18 = scalar_lea.vmem %s22_s24, 128  ;;  %p392_p12 = scmp.lt.s32.totalorder %s22_s24, %s22_s24 }
  0x1b   :  { %p388_p11 = scmp.ne.s32.totalorder %s22_s24, %s387_s18  ;;  %p393_p13 = scmp.lt.s32.totalorder %s387_s18, %s387_s18 }
  0x1d   :  { %p394_p0 = por %p393_p13, %p392_p12 }
  0x1f   :  { %p395_p1 = pnand %p394_p0, %p388_p11 }
  0x21   :  { %398 = shalt.err (!%p395_p1)
}
  0x22   :  { %24 = dma.hbm_to_vmem [thread:$0]  %s585_s0, 128, %s22_s24, [#allocation3]  }
  0x23   :  { %s475_s20 = smov [#allocation7]   ;;  %s399_s25 = scalar_lea.hbm %s588_s3, 512 }
  0x24   :  { %s42_s21 = sshll.u32 %s475_s20, 4  ;;  %p400_p2 = scmp.ne.s32.totalorder %s588_s3, %s399_s25  ;;  %s43_s21 = int_to_ptr.vmem [resolvable:$true] %s42_s21 }
  0x25   :  { %p403_p3 = scmp.lt.u32.totalorder %s399_s25, %s588_s3 }
  0x27   :  { %p405_p4 = pnand %p403_p3, %p400_p2 }
  0x29   :  { %408 = shalt.err (!%p405_p4)
}
  0x2a   :  { %s409_s30 = scalar_lea.vmem %s43_s21, 512  ;;  %p414_p6 = scmp.lt.s32.totalorder %s43_s21, %s43_s21 }
  0x2b   :  { %p410_p5 = scmp.ne.s32.totalorder %s43_s21, %s409_s30  ;;  %p415_p7 = scmp.lt.s32.totalorder %s409_s30, %s409_s30 }
  0x2d   :  { %p416_p8 = por %p415_p7, %p414_p6 }
  0x2f   :  { %p417_p9 = pnand %p416_p8, %p410_p5 }
  0x31   :  { %420 = shalt.err (!%p417_p9)
}
  0x32   :  { %s476_s0 = smov 128   ;;  %s477_s24 = smov 8  }
  0x33   :  { %48 = dma.hbm_to_vmem [thread:$0]  %s588_s3, 512, %s43_s21, [#allocation6], %s476_s0, %s476_s0, %s477_s24  }
  0x34   :  { %s478_s9 = smov [#allocation8]   ;;  %s421_s13 = scalar_lea.hbm %s589_s4, 512 }
  0x35   :  { %s54_s10 = sshll.u32 %s478_s9, 4  ;;  %p422_p10 = scmp.ne.s32.totalorder %s589_s4, %s421_s13  ;;  %s55_s10 = int_to_ptr.vmem [resolvable:$true] %s54_s10 }
  0x36   :  { %p425_p11 = scmp.lt.u32.totalorder %s421_s13, %s589_s4 }
  0x38   :  { %p427_p12 = pnand %p425_p11, %p422_p10 }
  0x3a   :  { %430 = shalt.err (!%p427_p12)
}
  0x3b   :  { %s431_s18 = scalar_lea.vmem %s55_s10, 512  ;;  %p436_p0 = scmp.lt.s32.totalorder %s55_s10, %s55_s10 }
  0x3c   :  { %p432_p13 = scmp.ne.s32.totalorder %s55_s10, %s431_s18  ;;  %p437_p1 = scmp.lt.s32.totalorder %s431_s18, %s431_s18 }
  0x3e   :  { %p438_p2 = por %p437_p1, %p436_p0 }
  0x40   :  { %p439_p3 = pnand %p438_p2, %p432_p13 }
  0x42   :  { %442 = shalt.err (!%p439_p3)
}
  0x43   :  { %60 = dma.hbm_to_vmem [thread:$0]  %s589_s4, 512, %s55_s10, [#allocation9], %s476_s0, %s476_s0, %s477_s24  }
  0x44   :  { %465 = dma.done.wait [#allocation3], 128  }
  0x45   :  { %466 = vsyncadd [#allocation3], 4294967168 }
  0x46   :  { %467 = dma.done.wait [#allocation6], 640  }
  0x47   :  { %468 = vsyncadd [#allocation6], 4294966656 }
  0x48   :  { %469 = dma.done.wait [#allocation9], 512  }
  0x49   :  { %470 = vsyncadd [#allocation9], 4294966784  ;;  %v479_v0 = vmov 0.0|0.0   ;;  %vm480_vm0 = vmmov 0   ;;  %v481_v1 = vmov 0.0   ;;  %v81_v2 = vlaneseq  ;;  %v94_v3 = vld [vmem:[#allocation7] sm:$0xff] }
  0x4a   :  { %330 = vmatprep.subr.bf16.mxu1 %v479_v0  ;;  %324 = vmatprep.subr.bf16.mxu0 %v479_v0  ;;  %v95_v4 = vld [vmem:[#allocation7 + $0x8] sm:$0xff]  ;;  %v98_v5 = vld [vmem:[#allocation8] sm:$0xff]  ;;  %v96_v9 = vld [vmem:[#allocation7 + $0x10] sm:$0xff]  ;;  %vm102_vm1 = vcmask 261120   ;;  %s482_s21 = smov 32   ;;  %s483_s22 = smov [#allocation10]  }
  0x4b   :  { %321 = vmatprep.mubr.msk.f32.mxu1 %vm480_vm0, %v481_v1  ;;  %310 = vmatprep.mubr.msk.f32.mxu0 %vm480_vm0, %v481_v1  ;;  %v82_v6 = vshrl.u32 %v81_v2, 7  ;;  %v331_v7 = vpack.c.bf16 %v95_v4, %v94_v3  ;;  %v99_v8 = vld [vmem:[#allocation8 + $0x8] sm:$0xff]  ;;  %v97_v10 = vld [vmem:[#allocation7 + $0x18] sm:$0xff]  ;;  %v100_v12 = vld [vmem:[#allocation8 + $0x10] sm:$0xff]  ;;  %s276_s23 = sshll.u32 %s483_s22, 4  ;;  %vm268_vm2 = vcmask 523520   ;;  %s277_s23 = int_to_ptr.vmem [resolvable:$true] %s276_s23 }
  0x4c   :  { %v325_v11 = vpack.c.bf16 %v99_v8, %v98_v5  ;;  %v101_v13 = vld [vmem:[#allocation8 + $0x18] sm:$0xff]  ;;  %v334_v14 = vpack.c.bf16 %v97_v10, %v96_v9  ;;  %v77_v15 = vld [vmem:[%s587_s2] sm:$0x1]  ;;  %s443_s25 = scalar_lea.vmem %s277_s23, 128  ;;  %p448_p5 = scmp.lt.s32.totalorder %s277_s23, %s277_s23 }
  0x4d   :  { %332 = vmatpush3.bf16.msra.mxu1 %v331_v7  ;;  %v328_v16 = vpack.c.bf16 %v101_v13, %v100_v12  ;;  %v78_v17 = vand.u32 2147483647, %v77_v15  ;;  %v83_v18 = vsub.s32 0, %v82_v6  ;;  %v75_v20 = vld [vmem:[#allocation2] sm:$0xff]  ;;  %v76_v26 = vld [vmem:[#allocation5] sm:$0xff]  ;;  %p444_p4 = scmp.ne.s32.totalorder %s277_s23, %s443_s25  ;;  %p449_p6 = scmp.lt.s32.totalorder %s443_s25, %s443_s25 }
  0x4e   :  { %326 = vmatpush3.bf16.msra.mxu0 %v325_v11  ;;  %333 = vmatprep.subr.bf16.mxu1 %v479_v0  ;;  %v290_v32 = vld [vmem:[%s590_s5] ss:$0 sm:$0xff] }
  0x4f   :  { %327 = vmatprep.subr.bf16.mxu0 %v479_v0  ;;  %v79_v19 = vadd.f32 1.0, %v78_v17  ;;  %p450_p7 = por %p449_p6, %p448_p5 }
  0x51   :  { %335 = vmatpush3.bf16.msra.mxu1 %v334_v14  ;;  %v84_v21 = vrot.slane %v79_v19, %v83_v18  ;;  %p451_p8 = pnand %p450_p7, %p444_p4 }
  0x52   :  { %329 = vmatpush3.bf16.msra.mxu0 %v328_v16 }
  0x53   :  { %v86_v22 = vmul.f32 %v84_v21, %v75_v20 }
  0x55   :  { %v287_v23 = vmul.f32 -1.442695, %v86_v22 }
  0x57   :  { %347 = vpow2.f32 %v287_v23 }
  0x61   :  { %v348_v24 = vpop.eup %347 }
  0x62   :  { %v90_v25 = vadd.f32 1.0, %v348_v24 }
  0x64   :  { %349 = vrcp.f32 %v90_v25 }
  0x6e   :  { %v350_v27 = vpop.eup %349 }
  0x6f   :  { %322 = vmatmul.mubr.msk.f32.vlgmr.msra.gmra.mrb[0].mxu1 %vm102_vm1, %v350_v27  ;;  %v93_v28 = vmul.f32 %v350_v27, %v76_v26 }
  0x71   :  { %311 = vmatmul.mubr.msk.f32.vlgmr.msra.gmra.mrb[0].mxu0 %vm102_vm1, %v93_v28 }
 0x142   :  { %v245_v29 = vpop.f32.mrb[0].mxu1 }
 0x143   :  { %v323_v30 = vpop.f32.mrb[1].mxu1 }
 0x144   :  { %v172_v31 = vpop.f32.mrb[0].mxu0 }
 0x145   :  { %v246_v33 = vadd.f32 %v245_v29, %v172_v31  ;;  %v312_v34 = vpop.f32.mrb[1].mxu0 }
 0x147   :  { %v256_v35 = vadd.f32 %v290_v32, %v246_v33 }
 0x149   :  { %v291_v36 = vmul.f32 -1.442695, %v256_v35  ;;  %257 = vst.msk [vmem:[#allocation10] sm:$0xff] %vm102_vm1, %v256_v35 }
 0x14b   :  { %351 = vpow2.f32 %v291_v36 }
 0x155   :  { %v352_v37 = vpop.eup %351 }
 0x156   :  { %v261_v38 = vadd.f32 1.0, %v352_v37 }
 0x158   :  { %353 = vrcp.f32 %v261_v38 }
 0x162   :  { %v354_v39 = vpop.eup %353 }
 0x163   :  { %265 = vrot.lane.b32.xlu0 %v354_v39, %s482_s21 }
 0x1d5   :  { %v266_v40 = vpop.permute.xlu0 %265 }
 0x1d6   :  { %269 = vst.msk [vmem:[#allocation10] sm:$0xff] %vm268_vm2, %v266_v40 }
 0x1d7   :  { %454 = shalt.err (!%p451_p8)
}
 0x1d8   :  { %s455_s27 = scalar_lea.hbm %s591_s6, 128 }
 0x1d9   :  { %p456_p9 = scmp.ne.s32.totalorder %s591_s6, %s455_s27  ;;  %p459_p10 = scmp.lt.u32.totalorder %s455_s27, %s591_s6 }
 0x1db   :  { %p461_p11 = pnand %p459_p10, %p456_p9 }
 0x1dd   :  { %464 = shalt.err (!%p461_p11)
}
 0x1de   :  { %279 = dma.vmem_to_hbm [thread:$0]  %s277_s23, 128, %s591_s6, [#allocation4]  }
 0x1df   :  { %471 = dma.done.wait [#allocation4], 128  }
 0x1e0   :  { %472 = vsyncadd [#allocation4], 4294967168 }
 0x1e1   :  { %283 = vsyncpa [#allocation3], 1 }
 0x1e2   :  { %284 = vsyncpa [#allocation6], 1 }
 0x1e3   :  { %285 = vsyncpa [#allocation9], 1 }
 0x1e4   :  { %286 = vsyncpa [#allocation4], 1 }

</bundles_post_ra>
